<compile_context>
chip_gen: v7x
topology: tpu7x:2x2x1
jax: 0.10.0
libtpu: 0.0.40
codegen_flags: <defaults>
</compile_context>

<pallas_src>
import functools

import jax
import jax.numpy as jnp
from jax import lax
from jax.experimental import pallas as pl
from jax.experimental.pallas import tpu as pltpu


def _attn_kernel(x_ref, w_ref, o_ref, *, trans_dtype):
    # x_ref: (Bt, S, H) bf16   w_ref: (H, H) bf16   o_ref: (Bt, S, H)
    bt, s, h = x_ref.shape
    xb = x_ref[...]                          # (Bt, S, H) bf16 (cast in wrapper)
    wb = w_ref[...]                          # (H, H) bf16

    # (1) x @ W with all folded batch rows in one MXU pass (M = Bt*S).
    #     Layout-free reshape: the block covers full S and H (S%8==0, H%128==0).
    xw2d = lax.dot_general(xb.reshape(bt * s, h), wb,
                           dimension_numbers=(((1,), (0,)), ((), ())),
                           preferred_element_type=jnp.float32)      # (Bt*S, H)
    xw = xw2d.reshape(bt, s, h).astype(jnp.bfloat16)

    # (2) scores = (xW) @ x^T as a batched contraction (no explicit transpose).
    scores = lax.dot_general(xw, xb,
                             dimension_numbers=(((2,), (2,)), ((0,), (0,))),
                             preferred_element_type=jnp.float32)    # (Bt, S, S)

    # (3) softmax.  tanh bounds scores to [-1, 1] => exp is overflow-safe
    #     WITHOUT the usual row-max subtraction (saves one XLU max-reduce and
    #     one VPU subtract over the full (Bt,S,S) tensor).
    scores = jnp.tanh(scores.astype(trans_dtype))    # bf16 EUP on v6e/v7x
    e = jnp.exp(scores)
    denom = jnp.sum(e.astype(jnp.float32), axis=-1, keepdims=True)
    # approx=True -> attention rows sum to 1 only to ~1e-3 relative; acceptable
    # alongside bf16 MXU operands.
    inv = pl.reciprocal(denom, approx=True)

    if s > h:
        # Cheaper to scale the (S, H) output than the (S, S) weights.
        # Unnormalized e is bounded in [exp(-1), exp(1)], so the bf16 cast is safe.
        out = lax.dot_general(e.astype(jnp.bfloat16), xb,
                              dimension_numbers=(((2,), (1,)), ((0,), (0,))),
                              preferred_element_type=jnp.float32)
        out = out * inv
    else:
        attn = (e * inv).astype(jnp.bfloat16)
        out = lax.dot_general(attn, xb,
                              dimension_numbers=(((2,), (1,)), ((0,), (0,))),
                              preferred_element_type=jnp.float32)

    o_ref[...] = out.astype(o_ref.dtype)


def _tpu_generation():
    try:
        kind = jax.devices()[0].device_kind.lower()
    except Exception:
        return 6
    if "v7" in kind or "tpu7" in kind:
        return 7
    if "v6" in kind:
        return 6
    if "v5" in kind:
        return 5
    return 4


def _vmem_capacity_bytes(gen):
    try:
        return int(pltpu.get_tpu_info().vmem_capacity_bytes)
    except Exception:
        return (64 << 20) if gen >= 7 else (128 << 20)


def _per_batch_vmem_bytes(S, H):
    # Per folded batch: double-buffered bf16 x block + f32 out block, xw
    # (f32 + bf16 copies), f32 out temp, plus the (S,S) scores/tanh/e f32
    # temporaries and a bf16 attn copy.
    return S * H * (2 * 2 + 2 * 4 + 4 + 2 + 4) + S * S * (3 * 4 + 2)


def _pick_batch_block(B, S, H, gen, vmem_budget):
    """Fold batches per grid step: fill MXU rows, bound VMEM (incl. S^2 temps)."""
    rows_target = 512 if gen >= 7 else 1024          # v7x: smaller VMEM -> smaller blocks
    rows_cap = max(1, rows_target // max(S, 1))
    vmem_cap = max(1, vmem_budget // max(_per_batch_vmem_bytes(S, H), 1))
    cap = max(1, min(rows_cap, vmem_cap))
    if gen >= 7 and B >= 2:
        cap = min(cap, max(1, B // 2))               # >=2 grid steps for the 2 TCs
    cap = min(cap, B)
    divisors = [d for d in range(1, cap + 1) if B % d == 0]
    bt = max(divisors)
    if gen >= 7:
        # prefer an even number of grid steps so neither TC idles a full step
        even = [d for d in divisors if (B // d) % 2 == 0]
        if even:
            bt = max(even)
    return bt


def seq_self_attention(x, w, *, batch_block=None):
    """x: (B, S, H), w: (H, H) -> (B, S, H) in x.dtype."""
    B, S, H = x.shape
    assert w.shape == (H, H)
    # Layout requirements: lane-dense full-H stores and a layout-free
    # (Bt*S, H) reshape inside the kernel.
    assert H % 128 == 0, "attention_size must be a multiple of 128"
    assert S % 8 == 0, "seq_length must be a multiple of 8"

    gen = _tpu_generation()
    capacity = _vmem_capacity_bytes(gen)
    if gen >= 7:                                     # 64 MiB/TC: leave headroom
        target_limit = min(capacity - (16 << 20), 46 << 20)
    else:                                            # 128 MiB: allow big blocks
        target_limit = min(capacity - (28 << 20), 100 << 20)
    target_limit = max(target_limit, 32 << 20)

    if batch_block is None:
        batch_block = _pick_batch_block(B, S, H, gen, int(0.7 * target_limit))
    assert B % batch_block == 0
    grid_b = B // batch_block

    # bf16 I/O for the dominant input stream; MXU accumulates in f32.
    xb = x.astype(jnp.bfloat16)
    wb = w.astype(jnp.bfloat16)
    # bf16 EUP exists on v6e/v7x; keep f32 transcendentals on v5e and older.
    trans_dtype = jnp.bfloat16 if gen >= 6 else jnp.float32

    # Scoped-VMEM estimate: double-buffered in/out blocks + resident W + kernel
    # temporaries (xw copies, out f32, scores/e f32, attn bf16).
    need = (2 * batch_block * S * H * 2              # bf16 x blocks (double-buffered)
            + 2 * batch_block * S * H * 4            # f32 out blocks (double-buffered)
            + 2 * H * H * 2                          # resident W
            + batch_block * (S * H * (4 + 2 + 4) + S * S * (3 * 4 + 2)))
    vmem_limit = int(min(max(32 << 20, need + need // 2), target_limit))

    cost = pl.CostEstimate(
        flops=2 * B * S * H * (H + 2 * S),
        transcendentals=2 * B * S * S,               # tanh + exp per score
        bytes_accessed=B * S * H * (2 + 4) + H * H * 2,   # bf16 in, f32 out
    )

    kernel = functools.partial(_attn_kernel, trans_dtype=trans_dtype)
    return pl.pallas_call(
        kernel,
        out_shape=jax.ShapeDtypeStruct((B, S, H), x.dtype),
        grid_spec=pltpu.PrefetchScalarGridSpec(
            num_scalar_prefetch=0,
            grid=(grid_b,),
            in_specs=[
                pl.BlockSpec((batch_block, S, H), lambda b: (b, 0, 0)),
                pl.BlockSpec((H, H), lambda b: (0, 0)),   # constant index: VMEM-resident
            ],
            out_specs=pl.BlockSpec((batch_block, S, H), lambda b: (b, 0, 0)),
        ),
        compiler_params=pltpu.CompilerParams(
            dimension_semantics=("parallel",),
            vmem_limit_bytes=vmem_limit,
        ),
        cost_estimate=cost,
    )(xb, wb)


def _reference(x, w):
    # Mirrors the kernel's bf16-MXU / f32-accumulate precision path but keeps
    # exact f32 tanh/exp/softmax, so the check isolates the kernel's approx
    # reciprocal and (on v6e/v7x) bf16 transcendentals.
    xb = x.astype(jnp.bfloat16)
    wb = w.astype(jnp.bfloat16)
    xw = jnp.einsum("bsh,hk->bsk", xb, wb, preferred_element_type=jnp.float32)
    scores = jnp.einsum("bsk,btk->bst", xw.astype(jnp.bfloat16), xb,
                        preferred_element_type=jnp.float32)
    scores = jnp.tanh(scores)
    attn = jax.nn.softmax(scores, axis=-1)
    out = jnp.einsum("bst,bth->bsh", attn.astype(jnp.bfloat16), xb,
                     preferred_element_type=jnp.float32)
    return out.astype(x.dtype)


if __name__ == "__main__":
    attention_size = 128          # module default; H == attention_size
    B, S, H = 2, 8, attention_size

    key = jax.random.PRNGKey(0)
    kx, kw = jax.random.split(key)

    # lstm_out stand-in
    x = jax.random.normal(kx, (B, S, H), dtype=jnp.float32)

    # deterministic xavier_uniform_ init for attention_weights (H, H)
    limit = (6.0 / (H + H)) ** 0.5
    w = jax.random.uniform(kw, (H, H), dtype=jnp.float32,
                           minval=-limit, maxval=limit)

    out = jax.block_until_ready(seq_self_attention(x, w))

    ref = _reference(x, w)
    assert out.shape == (B, S, H)
    # bf16 MXU operands + (v6e/v7x) bf16 tanh/exp + approx EUP reciprocal
    err = float(jnp.max(jnp.abs(out - ref)))
    assert jnp.allclose(out, ref, atol=4e-2, rtol=4e-2), err

    print("KERNEL_OK")
</pallas_src>

<mosaic_0001>
module attributes {stable_mosaic.version = 11 : i64} {
  func.func @_attn_kernel(%arg0: i32, %arg1: memref<2x8x128xbf16, #tpu.memory_space<vmem>>, %arg2: memref<128x128xbf16, #tpu.memory_space<vmem>>, %arg3: memref<2x8x128xf32, #tpu.memory_space<vmem>>) attributes {dimension_semantics = [#tpu.dimension_semantics<parallel>], iteration_bounds = array<i64: 1>, scalar_prefetch = 0 : i64, scratch_operands = 0 : i64, tpu.core_type = #tpu.core_type<tc>, window_params = [{transform_indices = @transform_0, window_bounds = array<i64: 2, 8, 128>}, {pipeline_mode = #tpu.pipeline_mode<synchronous>, transform_indices = @transform_1, window_bounds = array<i64: 128, 128>}, {transform_indices = @transform_2, window_bounds = array<i64: 2, 8, 128>}]} {
    %c0 = arith.constant 0 : index
    %c0_0 = arith.constant 0 : index
    %c0_1 = arith.constant 0 : index
    %0 = vector.load %arg1[%c0, %c0_0, %c0_1] : memref<2x8x128xbf16, #tpu.memory_space<vmem>>, vector<2x8x128xbf16>
    %c0_2 = arith.constant 0 : index
    %c0_3 = arith.constant 0 : index
    %1 = vector.load %arg2[%c0_2, %c0_3] : memref<128x128xbf16, #tpu.memory_space<vmem>>, vector<128x128xbf16>
    %2 = vector.shape_cast %0 : vector<2x8x128xbf16> to vector<16x128xbf16>
    %cst = arith.constant dense<0.000000e+00> : vector<16x128xf32>
    %3 = tpu.matmul %2, %1, %cst {dimension_numbers = #tpu.dot_dimension_numbers<[1], [0], [0], [1], [0, 0, 1, 1], [], []>} : vector<16x128xbf16>, vector<128x128xbf16>, vector<16x128xf32> -> vector<16x128xf32>
    %4 = vector.shape_cast %3 : vector<16x128xf32> to vector<2x8x128xf32>
    %5 = arith.truncf %4 : vector<2x8x128xf32> to vector<2x8x128xbf16>
    %cst_4 = arith.constant dense<0.000000e+00> : vector<2x8x8xf32>
    %6 = tpu.matmul %5, %0, %cst_4 {dimension_numbers = #tpu.dot_dimension_numbers<[2], [2], [1], [1], [0, 0, 0, 1, 1, 1], [0], [0]>} : vector<2x8x128xbf16>, vector<2x8x128xbf16>, vector<2x8x8xf32> -> vector<2x8x8xf32>
    %7 = math.tanh %6 : vector<2x8x8xf32>
    %8 = math.exp %7 : vector<2x8x8xf32>
    %cst_5 = arith.constant dense<0.000000e+00> : vector<2x8xf32>
    %9 = vector.multi_reduction <add>, %8, %cst_5 [2] : vector<2x8x8xf32> to vector<2x8xf32>
    %10 = vector.shape_cast %9 : vector<2x8xf32> to vector<2x8x1xf32>
    %11 = tpu.reciprocal %10 {approx = true} : vector<2x8x1xf32> -> vector<2x8x1xf32>
    %12 = vector.broadcast %11 : vector<2x8x1xf32> to vector<2x8x8xf32>
    %13 = arith.mulf %8, %12 : vector<2x8x8xf32>
    %14 = arith.truncf %13 : vector<2x8x8xf32> to vector<2x8x8xbf16>
    %cst_6 = arith.constant dense<0.000000e+00> : vector<2x8x128xf32>
    %15 = tpu.matmul %14, %0, %cst_6 {dimension_numbers = #tpu.dot_dimension_numbers<[2], [1], [1], [2], [0, 0, 0, 1, 1, 2], [0], [0]>} : vector<2x8x8xbf16>, vector<2x8x128xbf16>, vector<2x8x128xf32> -> vector<2x8x128xf32>
    %c0_7 = arith.constant 0 : index
    %c0_8 = arith.constant 0 : index
    %c0_9 = arith.constant 0 : index
    %16 = vector.load %arg3[%c0_7, %c0_8, %c0_9] : memref<2x8x128xf32, #tpu.memory_space<vmem>>, vector<2x8x128xf32>
    tpu.vector_store %arg3[%c0_7, %c0_8, %c0_9], %15 {strides = array<i32>} : memref<2x8x128xf32, #tpu.memory_space<vmem>>, vector<2x8x128xf32>,
    return
  }
  func.func @transform_0(%arg0: i32) -> (i32, i32, i32) {
    %c0_i32 = arith.constant 0 : i32
    %c0_i32_0 = arith.constant 0 : i32
    %c0_i32_1 = arith.constant 0 : i32
    return %arg0, %c0_i32, %c0_i32_0 : i32, i32, i32
  }
  func.func @transform_1(%arg0: i32) -> (i32, i32) {
    %c0_i32 = arith.constant 0 : i32
    %c0_i32_0 = arith.constant 0 : i32
    %c0_i32_1 = arith.constant 0 : i32
    return %c0_i32, %c0_i32_0 : i32, i32
  }
  func.func @transform_2(%arg0: i32) -> (i32, i32, i32) {
    %c0_i32 = arith.constant 0 : i32
    %c0_i32_0 = arith.constant 0 : i32
    %c0_i32_1 = arith.constant 0 : i32
    return %arg0, %c0_i32, %c0_i32_0 : i32, i32, i32
  }
}

</mosaic_0001>

<bundles_post_ra>
// kernel: tpu_custom_call.1
= control target key start
LH: loop header
LB: loop body
LE: loop exit
PB: predicated region body
PF: predicated region fallthrough
CT: control target
= control target key end

     0   :  { %7 = vsyncpa [#allocation3], 0  ;;  %s628_s0 = inlined_call_operand.hbm [shape: bf16[2,8,128], index: 0, kind: input, shape index: {}]   ;;  %s629_s1 = inlined_call_operand.hbm [shape: bf16[128,128], index: 1, kind: input, shape index: {}]   ;;  %s630_s2 = inlined_call_operand.hbm [shape: f32[2,8,128], index: 2, kind: output, shape index: {}]  }
   0x1   :  { %8 = vsyncpa [#allocation6], 0 }
   0x2   :  { %9 = vsyncpa [#allocation4], 0  ;;  %s542_s9 = smov [#allocation2]   ;;  %s470_s13 = scalar_lea.hbm %s628_s0, 128 }
   0x3   :  { %s15_s10 = sshll.u32 %s542_s9, 4  ;;  %p471_p0 = scmp.ne.s32.totalorder %s628_s0, %s470_s13  ;;  %s16_s10 = int_to_ptr.vmem [resolvable:$true] %s15_s10 }
   0x4   :  { %p474_p1 = scmp.lt.u32.totalorder %s470_s13, %s628_s0 }
   0x6   :  { %p476_p2 = pnand %p474_p1, %p471_p0 }
   0x8   :  { %479 = shalt.err (!%p476_p2)
}
   0x9   :  { %s480_s18 = scalar_lea.vmem %s16_s10, 128  ;;  %p485_p4 = scmp.lt.s32.totalorder %s16_s10, %s16_s10 }
   0xa   :  { %p481_p3 = scmp.ne.s32.totalorder %s16_s10, %s480_s18  ;;  %p486_p5 = scmp.lt.s32.totalorder %s480_s18, %s480_s18 }
   0xc   :  { %p487_p6 = por %p486_p5, %p485_p4 }
   0xe   :  { %p488_p7 = pnand %p487_p6, %p481_p3 }
  0x10   :  { %491 = shalt.err (!%p488_p7)
}
  0x11   :  { %s543_s19 = smov 64   ;;  %s544_s20 = smov 4  }
  0x12   :  { %21 = dma.hbm_to_vmem [thread:$0]  %s628_s0, 128, %s16_s10, [#allocation3], %s543_s19, %s543_s19, %s544_s20  }
  0x13   :  { %s545_s23 = smov [#allocation5]   ;;  %s492_s27 = scalar_lea.hbm %s629_s1, 1024 }
  0x14   :  { %s27_s24 = sshll.u32 %s545_s23, 4  ;;  %p493_p8 = scmp.ne.s32.totalorder %s629_s1, %s492_s27  ;;  %s28_s24 = int_to_ptr.vmem [resolvable:$true] %s27_s24 }
  0x15   :  { %p496_p9 = scmp.lt.u32.totalorder %s492_s27, %s629_s1 }
  0x17   :  { %p498_p10 = pnand %p496_p9, %p493_p8 }
  0x19   :  { %501 = shalt.err (!%p498_p10)
}
  0x1a   :  { %s502_s4 = scalar_lea.vmem %s28_s24, 1024  ;;  %p507_p12 = scmp.lt.s32.totalorder %s28_s24, %s28_s24 }
  0x1b   :  { %p503_p11 = scmp.ne.s32.totalorder %s28_s24, %s502_s4  ;;  %p508_p13 = scmp.lt.s32.totalorder %s502_s4, %s502_s4 }
  0x1d   :  { %p509_p0 = por %p508_p13, %p507_p12 }
  0x1f   :  { %p510_p1 = pnand %p509_p0, %p503_p11 }
  0x21   :  { %513 = shalt.err (!%p510_p1)
}
  0x22   :  { %33 = dma.hbm_to_vmem [thread:$0]  %s629_s1, 1024, %s28_s24, [#allocation6], %s543_s19, %s543_s19, %s544_s20  }
  0x23   :  { %536 = dma.done.wait [#allocation3], 128  }
  0x24   :  { %537 = vsyncadd [#allocation3], 4294967168 }
  0x25   :  { %538 = dma.done.wait [#allocation6], 1024  }
  0x26   :  { %539 = vsyncadd [#allocation6], 4294966272  ;;  %v546_v0 = vmov 0.0   ;;  %vm547_vm0 = vmmov 0   ;;  %v449_v1 = vld [vmem:[#allocation5] sm:$0xff]   ;;  %v450_v2 = vld [vmem:[#allocation5 + $0x8] sm:$0xff]  }
  0x27   :  { %396 = vmatprep.subr.bf16.mxu0 %v546_v0  ;;  %412 = vmatprep.mubr.msk.bf16.mxu0 %vm547_vm0, %v546_v0  ;;  %v451_v3 = vld [vmem:[#allocation5 + $0x10] sm:$0xff]   ;;  %v41_v4 = vld [vmem:[#allocation2] sm:$0xf]  ;;  %v453_v6 = vld [vmem:[#allocation5 + $0x20] sm:$0xff]   ;;  %vm242_vm1 = vcmask 64512   ;;  %vm258_vm2 = vcmask 1043456  }
  0x28   :  { %416 = vmatprep.subr.bf16.mxu1 %v546_v0  ;;  %418 = vmatprep.mubr.msk.bf16.mxu1 %vm547_vm0, %v546_v0  ;;  %v452_v5 = vld [vmem:[#allocation5 + $0x18] sm:$0xff]   ;;  %v454_v7 = vld [vmem:[#allocation5 + $0x28] sm:$0xff]   ;;  %v455_v8 = vld [vmem:[#allocation5 + $0x30] sm:$0xff]   ;;  %v260_v34 = vsel %vm258_vm2, %v41_v4, 0  ;;  %s548_s1 = smov [#allocation7]  }
  0x29   :  { %397 = vmatpush3.bf16.msra.mxu0 %v449_v1  ;;  %417 = vmatpush3.bf16.xpose.msra.mxu1 %v41_v4  ;;  %v456_v9 = vld [vmem:[#allocation5 + $0x38] sm:$0xff]   ;;  %s355_s6 = sshll.u32 %s548_s1, 4  ;;  %s356_s6 = int_to_ptr.vmem [resolvable:$true] %s355_s6 }
  0x2a   :  { %398 = vmatprep.subr.bf16.mxu0 %v546_v0  ;;  %422 = vmatprep.subr.bf16.mxu1 %v546_v0  ;;  %v42_v10 = vld [vmem:[#allocation2 + $0x4] sm:$0xf]  ;;  %s514_s7 = scalar_lea.vmem %s356_s6, 256  ;;  %p519_p3 = scmp.lt.s32.totalorder %s356_s6, %s356_s6 }
  0x2b   :  { %v368_v11 = vcombine.low %v41_v4, %v42_v10  ;;  %v306_v40 = vsel %vm258_vm2, %v42_v10, 0  ;;  %p515_p2 = scmp.ne.s32.totalorder %s356_s6, %s514_s7  ;;  %p520_p4 = scmp.lt.s32.totalorder %s514_s7, %s514_s7 }
  0x2d   :  { %399 = vmatpush3.bf16.msra.mxu0 %v450_v2  ;;  %p521_p5 = por %p520_p4, %p519_p3 }
  0x2e   :  { %400 = vmatprep.subr.bf16.mxu0 %v546_v0 }
  0x2f   :  { %p522_p6 = pnand %p521_p5, %p515_p2 }
  0x31   :  { %401 = vmatpush3.bf16.msra.mxu0 %v451_v3 }
  0x32   :  { %402 = vmatprep.subr.bf16.mxu0 %v546_v0 }
  0x35   :  { %403 = vmatpush3.bf16.msra.mxu0 %v452_v5 }
  0x36   :  { %404 = vmatprep.subr.bf16.mxu0 %v546_v0 }
  0x39   :  { %405 = vmatpush3.bf16.msra.mxu0 %v453_v6 }
  0x3a   :  { %406 = vmatprep.subr.bf16.mxu0 %v546_v0 }
  0x3d   :  { %407 = vmatpush3.bf16.msra.mxu0 %v454_v7 }
  0x3e   :  { %408 = vmatprep.subr.bf16.mxu0 %v546_v0 }
  0x41   :  { %409 = vmatpush3.bf16.msra.mxu0 %v455_v8 }
  0x42   :  { %410 = vmatprep.subr.bf16.mxu0 %v546_v0 }
  0x45   :  { %411 = vmatpush3.bf16.msra.mxu0 %v456_v9 }
  0x48   :  { %413 = vmatmul.mubr.bf16.vlgmr.msra.gmra.mrb[0].mxu0 %v368_v11 }
 0x11b   :  { %v147_v12 = vpop.f32.mrb[0].mxu0 }
 0x11c   :  { %v154_v13 = vpack.c.bf16 %v147_v12, %v147_v12  ;;  %v414_v14 = vpop.f32.mrb[1].mxu0 }
 0x11d   :  { %v150_v15 = vpop.f32.mrb[2].mxu0 }
 0x11e   :  { %v415_v16 = vpop.f32.mrb[3].mxu0  ;;  %419 = vmatmul.mubr.bf16.vlgmr.msra.gmra.mrb[0].mxu1 %v154_v13  ;;  %v155_v17 = vpack.c.bf16 %v150_v15, %v150_v15 }
 0x11f   :  { %423 = vmatpush3.bf16.xpose.msra.mxu1 %v42_v10  ;;  %424 = vmatprep.mubr.msk.bf16.mxu1 %vm547_vm0, %v546_v0 }
 0x120   :  { %428 = vmatprep.subr.bf16.mxu1 %v546_v0 }
 0x126   :  { %425 = vmatmul.mubr.bf16.vlgmr.msra.gmra.mrb[4].mxu1 %v155_v17 }
 0x127   :  { %430 = vmatprep.mubr.msk.bf16.mxu1 %vm547_vm0, %v546_v0  ;;  %429 = vmatpush3.bf16.msra.mxu1 %v260_v34 }
 0x128   :  { %434 = vmatprep.subr.bf16.mxu1 %v546_v0 }
 0x1f1   :  { %v190_v18 = vpop.f32.mrb[0].mxu1 }
 0x1f2   :  { %458 = vtanh.f32 %v190_v18  ;;  %v420_v19 = vpop.f32.mrb[1].mxu1 }
 0x1f3   :  { %v193_v20 = vpop.f32.mrb[2].mxu1 }
 0x1f4   :  { %v421_v21 = vpop.f32.mrb[3].mxu1 }
 0x1f9   :  { %v230_v22 = vpop.f32.mrb[4].mxu1 }
 0x1fa   :  { %460 = vtanh.f32 %v230_v22  ;;  %v426_v23 = vpop.f32.mrb[5].mxu1 }
 0x1fb   :  { %v233_v24 = vpop.f32.mrb[6].mxu1 }
 0x1fc   :  { %v459_v25 = vpop.eup %458  ;;  %v427_v26 = vpop.f32.mrb[7].mxu1 }
 0x1fd   :  { %v238_v27 = vmul.f32 1.442695, %v459_v25 }
 0x1ff   :  { %462 = vpow2.f32 %v238_v27 }
 0x204   :  { %v461_v28 = vpop.eup %460 }
 0x205   :  { %v240_v29 = vmul.f32 1.442695, %v461_v28 }
 0x207   :  { %464 = vpow2.f32 %v240_v29 }
 0x209   :  { %v463_v30 = vpop.eup %462 }
 0x20a   :  { %v243_v31 = vsel %vm242_vm1, %v463_v30, 0.0 }
 0x20b   :  { %244 = vadd.xlane.f32.xlu0 %v243_v31 }
 0x211   :  { %v465_v32 = vpop.eup %464 }
 0x212   :  { %v246_v33 = vsel %vm242_vm1, %v465_v32, 0.0 }
 0x213   :  { %247 = vadd.xlane.f32.xlu0 %v246_v33 }
 0x298   :  { %v245_v35 = vpop.xlane.xlu0 %244 }
 0x299   :  { %466 = vrcp.f32 %v245_v35 }
 0x2a0   :  { %v248_v36 = vpop.xlane.xlu0 %247 }
 0x2a1   :  { %468 = vrcp.f32 %v248_v36 }
 0x2a3   :  { %v467_v37 = vpop.eup %466 }
 0x2a4   :  { %v251_v38 = vmul.f32 %v467_v37, %v463_v30 }
 0x2a6   :  { %v253_v39 = vpack.c.bf16 %v251_v38, %v251_v38 }
 0x2a8   :  { %431 = vmatmul.mubr.msk.bf16.vlgmr.msra.gmra.mrb[8].mxu1 %vm242_vm1, %v253_v39 }
 0x2a9   :  { %435 = vmatpush3.bf16.msra.mxu1 %v306_v40  ;;  %436 = vmatprep.mubr.msk.bf16.mxu1 %vm547_vm0, %v546_v0 }
 0x2ab   :  { %v469_v41 = vpop.eup %468 }
 0x2ac   :  { %v252_v42 = vmul.f32 %v469_v41, %v465_v32 }
 0x2ae   :  { %v254_v43 = vpack.c.bf16 %v252_v42, %v252_v42 }
 0x2b0   :  { %437 = vmatmul.mubr.msk.bf16.vlgmr.msra.gmra.mrb[12].mxu1 %vm242_vm1, %v254_v43 }
 0x37b   :  { %v296_v44 = vpop.f32.mrb[8].mxu1 }
 0x37c   :  { %348 = vst [vmem:[#allocation7] sm:$0xff] %v296_v44  ;;  %v432_v45 = vpop.f32.mrb[9].mxu1 }
 0x37d   :  { %v299_v46 = vpop.f32.mrb[10].mxu1 }
 0x37e   :  { %v433_v47 = vpop.f32.mrb[11].mxu1 }
 0x383   :  { %v342_v48 = vpop.f32.mrb[12].mxu1 }
 0x384   :  { %349 = vst [vmem:[#allocation7 + $0x8] sm:$0xff] %v342_v48  ;;  %v438_v49 = vpop.f32.mrb[13].mxu1 }
 0x385   :  { %v345_v50 = vpop.f32.mrb[14].mxu1 }
 0x386   :  { %525 = shalt.err (!%p522_p6)
}
 0x387   :  { %s526_s10 = scalar_lea.hbm %s630_s2, 256 }
 0x388   :  { %p527_p7 = scmp.ne.s32.totalorder %s630_s2, %s526_s10  ;;  %p530_p8 = scmp.lt.u32.totalorder %s526_s10, %s630_s2 }
 0x38a   :  { %p532_p9 = pnand %p530_p8, %p527_p7 }
 0x38c   :  { %535 = shalt.err (!%p532_p9)
}
 0x38d   :  { %s549_s15 = smov 128   ;;  %s550_s16 = smov 8   ;;  %v439_v51 = vpop.f32.mrb[15].mxu1 }
 0x38e   :  { %361 = dma.vmem_to_hbm [thread:$0]  %s356_s6, 256, %s630_s2, [#allocation4], %s549_s15, %s549_s15, %s550_s16  }
 0x38f   :  { %540 = dma.done.wait [#allocation4], 256  }
 0x390   :  { %541 = vsyncadd [#allocation4], 4294967040 }
 0x391   :  { %365 = vsyncpa [#allocation3], 1 }
 0x392   :  { %366 = vsyncpa [#allocation6], 1 }
 0x393   :  { %367 = vsyncpa [#allocation4], 1 }

</bundles_post_ra>
